<compile_context>
chip_gen: v5e
topology: v5e:2x2
jax: 0.10.0
libtpu: 0.0.40
codegen_flags: <defaults>
</compile_context>

<pallas_src>
import functools

import jax
import jax.numpy as jnp
from jax.experimental import pallas as pl
from jax.experimental.pallas import tpu as pltpu


def _vmem_capacity_bytes():
    """Physical VMEM of the current chip; conservative fallback if the query fails."""
    try:
        return int(pltpu.get_tpu_info().vmem_capacity_bytes)
    except Exception:
        return 64 * 1024 * 1024  # v7x physical (smallest of v5e/v6e/v7x)


def _pick_spatial_tile(hw, cin, cout, x_bytes, out_bytes):
    """Lane tile targeting ~2 MiB HBM traffic/step, fitting well inside VMEM."""
    vmem_cap = _vmem_capacity_bytes()
    # Streaming working set per column: double-buffered x in + double-buffered out
    # + one f32 temporary (Cout, T) block for the matmul result.
    per_col = 2 * cin * x_bytes + 2 * cout * out_bytes + cout * 4
    budget = int(vmem_cap * 0.45)
    traffic_per_col = cin * x_bytes + cout * out_bytes
    t = min((2 * 1024 * 1024) // traffic_per_col, budget // per_col)
    t = max(128, (t // 128) * 128)
    if hw <= t:
        return hw  # single full-extent tile (allowed even if not a multiple of 128)
    return t


def _stats_kernel(x_ref, s_ref, g_ref, *, hw, tile, ntpc, nt, ragged):
    """Accumulate s = SUM_cols x and G = x @ x^T for this spatial tile."""
    c = pl.program_id(1)
    j = pl.program_id(2)

    @pl.when(j == 0)
    def _():
        s_ref[...] = jnp.zeros_like(s_ref)
        g_ref[...] = jnp.zeros_like(g_ref)

    def accumulate(x):
        # Per-channel sum rides the XLU slot; Gram matrix is one small MXU op.
        s_ref[...] += jnp.sum(x.astype(jnp.float32), axis=1, keepdims=True)
        g_ref[...] += jax.lax.dot_general(
            x, x,
            dimension_numbers=(((1,), (1,)), ((), ())),  # x @ x^T, no transpose copy
            preferred_element_type=jnp.float32,
        )

    if ragged:
        g_idx = c * ntpc + j
        is_tail = g_idx == nt - 1

        @pl.when(g_idx != nt - 1)
        def _():
            accumulate(x_ref[...])

        @pl.when(is_tail)
        def _():
            # Tail tile extends past H*W: zero the undefined columns of x (mask must
            # be on x, not y, for the Gram/sum statistics).
            x = x_ref[...]
            valid = hw - g_idx * tile
            col = jax.lax.broadcasted_iota(jnp.int32, x.shape, 1)
            accumulate(jnp.where(col < valid, x, jnp.zeros_like(x)))
    else:
        accumulate(x_ref[...])


def _apply_kernel(x_ref, ws_ref, bias_ref, o_ref):
    """out = clip((scale*W) @ x + bias, 0, 6) — conv recomputed with BN folded in."""
    y = jnp.dot(ws_ref[...], x_ref[...], preferred_element_type=jnp.float32)  # (Cout, T)
    o_ref[...] = jnp.clip(y + bias_ref[...], 0.0, 6.0).astype(o_ref.dtype)


@functools.partial(jax.jit, static_argnames=("eps", "spatial_tile"))
def conv1x1_bn_relu6(x_nchw, weight, gamma, beta, eps=1e-5, spatial_tile=None):
    """x_nchw: (N, Cin, H, W); weight: (Cout, Cin) (1x1 conv kernel squeezed)."""
    N, Cin, H, W = x_nchw.shape
    Cout = weight.shape[0]
    HW = H * W
    M = N * HW

    x3d = x_nchw.reshape(N, Cin, HW)          # free reshape; keep native dtype (no HBM copy)
    w = weight.astype(jnp.float32)            # (Cout, Cin), tiny
    x_bytes = x3d.dtype.itemsize
    out_dtype = x_nchw.dtype
    out_bytes = jnp.dtype(out_dtype).itemsize

    if spatial_tile is not None:
        t = min(int(spatial_tile), HW)
    else:
        t = _pick_spatial_tile(HW, Cin, Cout, x_bytes, out_bytes)
    nt = pl.cdiv(HW, t)
    ragged = (HW % t) != 0

    # Extra "parallel" spatial-chunk axis for the stats pass (helps v7x / megacore
    # when N is 1 or odd).  Only chunk when it divides evenly to keep the tail simple.
    n_chunks = 2 if (nt >= 2 and nt % 2 == 0) else 1
    ntpc = nt // n_chunks

    vmem_cap = _vmem_capacity_bytes()
    vmem_limit = max(32 * 1024 * 1024, min(int(vmem_cap * 0.75), 96 * 1024 * 1024))

    # ---------- Pass 1: linear sufficient statistics (y never touches HBM) ----------
    stats_cost = pl.CostEstimate(
        flops=int(M) * (2 * Cin * Cin + Cin),
        transcendentals=0,
        bytes_accessed=int(N * Cin * HW * x_bytes
                           + N * n_chunks * (Cin + Cin * Cin) * 4),
    )
    psum, pgram = pl.pallas_call(
        functools.partial(_stats_kernel, hw=HW, tile=t, ntpc=ntpc, nt=nt, ragged=ragged),
        out_shape=(
            jax.ShapeDtypeStruct((N * n_chunks, Cin, 1), jnp.float32),
            jax.ShapeDtypeStruct((N * n_chunks, Cin, Cin), jnp.float32),
        ),
        grid_spec=pltpu.PrefetchScalarGridSpec(
            num_scalar_prefetch=0,
            grid=(N, n_chunks, ntpc),
            in_specs=[
                pl.BlockSpec((None, Cin, t), lambda n, c, j: (n, 0, c * ntpc + j)),
            ],
            out_specs=[
                # per-(batch, chunk) partial accumulators; reduced over the
                # "arbitrary" tile axis in-kernel, over (n, chunk) in JAX glue.
                pl.BlockSpec((None, Cin, 1), lambda n, c, j: (n * n_chunks + c, 0, 0)),
                pl.BlockSpec((None, Cin, Cin), lambda n, c, j: (n * n_chunks + c, 0, 0)),
            ],
        ),
        compiler_params=pltpu.CompilerParams(
            dimension_semantics=("parallel", "parallel", "arbitrary"),
            vmem_limit_bytes=vmem_limit,
        ),
        cost_estimate=stats_cost,
    )(x3d)

    # ---------- Tiny per-channel glue: stats -> folded scale / bias ----------
    s_tot = jnp.sum(psum, axis=0)[:, 0]            # (Cin,)
    g_tot = jnp.sum(pgram, axis=0)                 # (Cin, Cin)
    m_f = jnp.float32(M)
    mean = (w @ s_tot) / m_f                       # (Cout,)
    ey2 = jnp.sum((w @ g_tot) * w, axis=1) / m_f   # (Cout,)  w_c^T G w_c / M
    # Biased variance (PyTorch BN training normalization). E[y^2]-E[y]^2 in f32 can go
    # slightly negative via cancellation; clamp at 0 (eps keeps rsqrt finite).
    var = jnp.maximum(ey2 - mean * mean, 0.0)
    scale = gamma.astype(jnp.float32) * jax.lax.rsqrt(var + eps)   # (Cout,)
    bias = beta.astype(jnp.float32) - mean * scale                 # (Cout,)
    w_fold = w * scale[:, None]                                    # BN scale folded into W
    bias_col = bias[:, None]                                       # (Cout, 1)

    # ---------- Pass 2: recompute conv with folded BN, add bias, ReLU6 ----------
    apply_cost = pl.CostEstimate(
        flops=int(M) * (2 * Cout * Cin + 3 * Cout),
        transcendentals=0,
        bytes_accessed=int(N * Cin * HW * x_bytes + N * Cout * HW * out_bytes),
    )
    out3d = pl.pallas_call(
        _apply_kernel,
        out_shape=jax.ShapeDtypeStruct((N, Cout, HW), out_dtype),
        grid_spec=pltpu.PrefetchScalarGridSpec(
            num_scalar_prefetch=0,
            grid=(N, nt),
            in_specs=[
                pl.BlockSpec((None, Cin, t), lambda n, j: (n, 0, j)),
                pl.BlockSpec((Cout, Cin), lambda n, j: (0, 0)),
                pl.BlockSpec((Cout, 1), lambda n, j: (0, 0)),
            ],
            out_specs=pl.BlockSpec((None, Cout, t), lambda n, j: (n, 0, j)),
        ),
        compiler_params=pltpu.CompilerParams(
            dimension_semantics=("parallel", "parallel"),
            vmem_limit_bytes=vmem_limit,
        ),
        cost_estimate=apply_cost,
    )(x3d, w_fold, bias_col)

    return out3d.reshape(N, Cout, H, W)            # free reshape (already NCHW order)


def _reference(x_nchw, weight, gamma, beta, eps=1e-5):
    """Pure-JAX reference matching the PyTorch training-mode forward."""
    y = jnp.einsum("nchw,oc->nohw", x_nchw.astype(jnp.float32), weight.astype(jnp.float32))
    mean = jnp.mean(y, axis=(0, 2, 3), keepdims=True)
    var = jnp.mean((y - mean) ** 2, axis=(0, 2, 3), keepdims=True)
    yhat = (y - mean) * jax.lax.rsqrt(var + eps)
    yhat = yhat * gamma.reshape(1, -1, 1, 1) + beta.reshape(1, -1, 1, 1)
    return jnp.clip(yhat, 0.0, 6.0)


if __name__ == "__main__":
    key = jax.random.PRNGKey(0)

    # ---- Test 1: primary shape (auto tile => single full-extent tile) ----
    N, Cin, H, W = 2, 4, 16, 16
    Cout = 8
    kx, kw, kg, kb, key = jax.random.split(key, 5)
    x = jax.random.normal(kx, (N, Cin, H, W), dtype=jnp.float32)
    weight = jax.random.normal(kw, (Cout, Cin), dtype=jnp.float32) * 0.5
    gamma = 1.0 + 0.1 * jax.random.normal(kg, (Cout,), dtype=jnp.float32)
    beta = 0.1 * jax.random.normal(kb, (Cout,), dtype=jnp.float32)

    out = jax.block_until_ready(conv1x1_bn_relu6(x, weight, gamma, beta))
    ref = _reference(x, weight, gamma, beta)
    assert out.shape == (N, Cout, H, W)
    assert jnp.allclose(out, ref, atol=1e-4, rtol=1e-4), "mismatch vs reference (test 1)"

    # ---- Test 2: ragged H*W + chunked parallel stats pass (forced small tile) ----
    N2, Cin2, H2, W2 = 1, 3, 20, 20   # H*W = 400, tile 128 -> 4 tiles, ragged tail
    Cout2 = 5
    kx2, kw2, kg2, kb2, key = jax.random.split(key, 5)
    x2 = jax.random.normal(kx2, (N2, Cin2, H2, W2), dtype=jnp.float32)
    weight2 = jax.random.normal(kw2, (Cout2, Cin2), dtype=jnp.float32) * 0.5
    gamma2 = 1.0 + 0.1 * jax.random.normal(kg2, (Cout2,), dtype=jnp.float32)
    beta2 = 0.1 * jax.random.normal(kb2, (Cout2,), dtype=jnp.float32)

    out2 = jax.block_until_ready(
        conv1x1_bn_relu6(x2, weight2, gamma2, beta2, spatial_tile=128))
    ref2 = _reference(x2, weight2, gamma2, beta2)
    assert out2.shape == (N2, Cout2, H2, W2)
    assert jnp.allclose(out2, ref2, atol=1e-4, rtol=1e-4), "mismatch vs reference (test 2)"

    print("KERNEL_OK")
</pallas_src>

<mosaic_0001>
module attributes {stable_mosaic.version = 11 : i64} {
  func.func @_stats_kernel(%arg0: i32, %arg1: i32, %arg2: i32, %arg3: memref<1x4x256xf32, #tpu.memory_space<vmem>>, %arg4: memref<1x4x1xf32, #tpu.memory_space<vmem>>, %arg5: memref<1x4x4xf32, #tpu.memory_space<vmem>>) attributes {dimension_semantics = [#tpu.dimension_semantics<parallel>, #tpu.dimension_semantics<parallel>, #tpu.dimension_semantics<arbitrary>], iteration_bounds = array<i64: 2, 1, 1>, scalar_prefetch = 0 : i64, scratch_operands = 0 : i64, tpu.core_type = #tpu.core_type<tc>, window_params = [{transform_indices = @transform_0, window_bounds = array<i64: 1, 4, 256>}, {transform_indices = @transform_1, window_bounds = array<i64: 1, 4, 1>}, {transform_indices = @transform_2, window_bounds = array<i64: 1, 4, 4>}]} {
    %c0_i32 = arith.constant 0 : i32
    %0 = arith.cmpi eq, %arg2, %c0_i32 : i32
    %1 = arith.extui %0 : i1 to i32
    %c0_i32_0 = arith.constant 0 : i32
    %2 = arith.cmpi ne, %1, %c0_i32_0 : i32
    scf.if %2 {
      %cst_16 = arith.constant 0.000000e+00 : f32
      %20 = vector.broadcast %cst_16 : f32 to vector<4x1xf32>
      %c0_17 = arith.constant 0 : index
      %c0_18 = arith.constant 0 : index
      %c0_19 = arith.constant 0 : index
      %21 = vector.load %arg4[%c0_17, %c0_18, %c0_19] : memref<1x4x1xf32, #tpu.memory_space<vmem>>, vector<1x4x1xf32>
      %22 = vector.shape_cast %21 : vector<1x4x1xf32> to vector<4x1xf32>
      %23 = vector.shape_cast %20 : vector<4x1xf32> to vector<1x4x1xf32>
      tpu.vector_store %arg4[%c0_17, %c0_18, %c0_19], %23 {strides = array<i32>} : memref<1x4x1xf32, #tpu.memory_space<vmem>>, vector<1x4x1xf32>,
      %cst_20 = arith.constant 0.000000e+00 : f32
      %24 = vector.broadcast %cst_20 : f32 to vector<4x4xf32>
      %c0_21 = arith.constant 0 : index
      %c0_22 = arith.constant 0 : index
      %c0_23 = arith.constant 0 : index
      %25 = vector.load %arg5[%c0_21, %c0_22, %c0_23] : memref<1x4x4xf32, #tpu.memory_space<vmem>>, vector<1x4x4xf32>
      %26 = vector.shape_cast %25 : vector<1x4x4xf32> to vector<4x4xf32>
      %27 = vector.shape_cast %24 : vector<4x4xf32> to vector<1x4x4xf32>
      tpu.vector_store %arg5[%c0_21, %c0_22, %c0_23], %27 {strides = array<i32>} : memref<1x4x4xf32, #tpu.memory_space<vmem>>, vector<1x4x4xf32>,
    } else {
    }
    %c0 = arith.constant 0 : index
    %c0_1 = arith.constant 0 : index
    %c0_2 = arith.constant 0 : index
    %3 = vector.load %arg3[%c0, %c0_1, %c0_2] : memref<1x4x256xf32, #tpu.memory_space<vmem>>, vector<1x4x256xf32>
    %4 = vector.shape_cast %3 : vector<1x4x256xf32> to vector<4x256xf32>
    %c0_3 = arith.constant 0 : index
    %c0_4 = arith.constant 0 : index
    %c0_5 = arith.constant 0 : index
    %5 = vector.load %arg4[%c0_3, %c0_4, %c0_5] : memref<1x4x1xf32, #tpu.memory_space<vmem>>, vector<1x4x1xf32>
    %6 = vector.shape_cast %5 : vector<1x4x1xf32> to vector<4x1xf32>
    %cst = arith.constant dense<0.000000e+00> : vector<4xf32>
    %7 = vector.multi_reduction <add>, %4, %cst [1] : vector<4x256xf32> to vector<4xf32>
    %8 = vector.shape_cast %7 : vector<4xf32> to vector<4x1xf32>
    %9 = arith.addf %6, %8 : vector<4x1xf32>
    %c0_6 = arith.constant 0 : index
    %c0_7 = arith.constant 0 : index
    %c0_8 = arith.constant 0 : index
    %10 = vector.load %arg4[%c0_6, %c0_7, %c0_8] : memref<1x4x1xf32, #tpu.memory_space<vmem>>, vector<1x4x1xf32>
    %11 = vector.shape_cast %10 : vector<1x4x1xf32> to vector<4x1xf32>
    %12 = vector.shape_cast %9 : vector<4x1xf32> to vector<1x4x1xf32>
    tpu.vector_store %arg4[%c0_6, %c0_7, %c0_8], %12 {strides = array<i32>} : memref<1x4x1xf32, #tpu.memory_space<vmem>>, vector<1x4x1xf32>,
    %c0_9 = arith.constant 0 : index
    %c0_10 = arith.constant 0 : index
    %c0_11 = arith.constant 0 : index
    %13 = vector.load %arg5[%c0_9, %c0_10, %c0_11] : memref<1x4x4xf32, #tpu.memory_space<vmem>>, vector<1x4x4xf32>
    %14 = vector.shape_cast %13 : vector<1x4x4xf32> to vector<4x4xf32>
    %cst_12 = arith.constant dense<0.000000e+00> : vector<4x4xf32>
    %15 = tpu.matmul %4, %4, %cst_12 {dimension_numbers = #tpu.dot_dimension_numbers<[1], [1], [0], [0], [0, 0, 1, 0], [], []>} : vector<4x256xf32>, vector<4x256xf32>, vector<4x4xf32> -> vector<4x4xf32>
    %16 = arith.addf %14, %15 : vector<4x4xf32>
    %c0_13 = arith.constant 0 : index
    %c0_14 = arith.constant 0 : index
    %c0_15 = arith.constant 0 : index
    %17 = vector.load %arg5[%c0_13, %c0_14, %c0_15] : memref<1x4x4xf32, #tpu.memory_space<vmem>>, vector<1x4x4xf32>
    %18 = vector.shape_cast %17 : vector<1x4x4xf32> to vector<4x4xf32>
    %19 = vector.shape_cast %16 : vector<4x4xf32> to vector<1x4x4xf32>
    tpu.vector_store %arg5[%c0_13, %c0_14, %c0_15], %19 {strides = array<i32>} : memref<1x4x4xf32, #tpu.memory_space<vmem>>, vector<1x4x4xf32>,
    return
  }
  func.func @transform_0(%arg0: i32, %arg1: i32, %arg2: i32) -> (i32, i32, i32) {
    %c1_i32 = arith.constant 1 : i32
    %0 = arith.muli %arg1, %c1_i32 : i32
    %1 = arith.addi %0, %arg2 : i32
    %c0_i32 = arith.constant 0 : i32
    %c0_i32_0 = arith.constant 0 : i32
    return %arg0, %c0_i32, %1 : i32, i32, i32
  }
  func.func @transform_1(%arg0: i32, %arg1: i32, %arg2: i32) -> (i32, i32, i32) {
    %c1_i32 = arith.constant 1 : i32
    %0 = arith.muli %arg0, %c1_i32 : i32
    %1 = arith.addi %0, %arg1 : i32
    %c0_i32 = arith.constant 0 : i32
    %c0_i32_0 = arith.constant 0 : i32
    %c0_i32_1 = arith.constant 0 : i32
    return %1, %c0_i32, %c0_i32_0 : i32, i32, i32
  }
  func.func @transform_2(%arg0: i32, %arg1: i32, %arg2: i32) -> (i32, i32, i32) {
    %c1_i32 = arith.constant 1 : i32
    %0 = arith.muli %arg0, %c1_i32 : i32
    %1 = arith.addi %0, %arg1 : i32
    %c0_i32 = arith.constant 0 : i32
    %c0_i32_0 = arith.constant 0 : i32
    %c0_i32_1 = arith.constant 0 : i32
    return %1, %c0_i32, %c0_i32_0 : i32, i32, i32
  }
}

module attributes {stable_mosaic.version = 11 : i64} {
  func.func @_apply_kernel(%arg0: i32, %arg1: i32, %arg2: memref<1x4x256xf32, #tpu.memory_space<vmem>>, %arg3: memref<8x4xf32, #tpu.memory_space<vmem>>, %arg4: memref<8x1xf32, #tpu.memory_space<vmem>>, %arg5: memref<1x8x256xf32, #tpu.memory_space<vmem>>) attributes {dimension_semantics = [#tpu.dimension_semantics<parallel>, #tpu.dimension_semantics<parallel>], iteration_bounds = array<i64: 2, 1>, scalar_prefetch = 0 : i64, scratch_operands = 0 : i64, tpu.core_type = #tpu.core_type<tc>, window_params = [{transform_indices = @transform_0, window_bounds = array<i64: 1, 4, 256>}, {pipeline_mode = #tpu.pipeline_mode<synchronous>, transform_indices = @transform_1, window_bounds = array<i64: 8, 4>}, {pipeline_mode = #tpu.pipeline_mode<synchronous>, transform_indices = @transform_2, window_bounds = array<i64: 8, 1>}, {transform_indices = @transform_3, window_bounds = array<i64: 1, 8, 256>}]} {
    %c0 = arith.constant 0 : index
    %c0_0 = arith.constant 0 : index
    %0 = vector.load %arg3[%c0, %c0_0] : memref<8x4xf32, #tpu.memory_space<vmem>>, vector<8x4xf32>
    %c0_1 = arith.constant 0 : index
    %c0_2 = arith.constant 0 : index
    %c0_3 = arith.constant 0 : index
    %1 = vector.load %arg2[%c0_1, %c0_2, %c0_3] : memref<1x4x256xf32, #tpu.memory_space<vmem>>, vector<1x4x256xf32>
    %2 = vector.shape_cast %1 : vector<1x4x256xf32> to vector<4x256xf32>
    %cst = arith.constant dense<0.000000e+00> : vector<8x256xf32>
    %3 = tpu.matmul %0, %2, %cst {dimension_numbers = #tpu.dot_dimension_numbers<[1], [0], [0], [1], [0, 0, 1, 1], [], []>} : vector<8x4xf32>, vector<4x256xf32>, vector<8x256xf32> -> vector<8x256xf32>
    %c0_4 = arith.constant 0 : index
    %c0_5 = arith.constant 0 : index
    %4 = vector.load %arg4[%c0_4, %c0_5] : memref<8x1xf32, #tpu.memory_space<vmem>>, vector<8x1xf32>
    %5 = vector.broadcast %4 : vector<8x1xf32> to vector<8x256xf32>
    %6 = arith.addf %3, %5 : vector<8x256xf32>
    %cst_6 = arith.constant 0.000000e+00 : f32
    %cst_7 = arith.constant 6.000000e+00 : f32
    %7 = vector.broadcast %cst_6 : f32 to vector<8x256xf32>
    %8 = arith.maximumf %7, %6 : vector<8x256xf32>
    %9 = vector.broadcast %cst_7 : f32 to vector<8x256xf32>
    %10 = arith.minimumf %9, %8 : vector<8x256xf32>
    %c0_8 = arith.constant 0 : index
    %c0_9 = arith.constant 0 : index
    %c0_10 = arith.constant 0 : index
    %11 = vector.load %arg5[%c0_8, %c0_9, %c0_10] : memref<1x8x256xf32, #tpu.memory_space<vmem>>, vector<1x8x256xf32>
    %12 = vector.shape_cast %11 : vector<1x8x256xf32> to vector<8x256xf32>
    %13 = vector.shape_cast %10 : vector<8x256xf32> to vector<1x8x256xf32>
    tpu.vector_store %arg5[%c0_8, %c0_9, %c0_10], %13 {strides = array<i32>} : memref<1x8x256xf32, #tpu.memory_space<vmem>>, vector<1x8x256xf32>,
    return
  }
  func.func @transform_0(%arg0: i32, %arg1: i32) -> (i32, i32, i32) {
    %c0_i32 = arith.constant 0 : i32
    %c0_i32_0 = arith.constant 0 : i32
    return %arg0, %c0_i32, %arg1 : i32, i32, i32
  }
  func.func @transform_1(%arg0: i32, %arg1: i32) -> (i32, i32) {
    %c0_i32 = arith.constant 0 : i32
    %c0_i32_0 = arith.constant 0 : i32
    %c0_i32_1 = arith.constant 0 : i32
    return %c0_i32, %c0_i32_0 : i32, i32
  }
  func.func @transform_2(%arg0: i32, %arg1: i32) -> (i32, i32) {
    %c0_i32 = arith.constant 0 : i32
    %c0_i32_0 = arith.constant 0 : i32
    %c0_i32_1 = arith.constant 0 : i32
    return %c0_i32, %c0_i32_0 : i32, i32
  }
  func.func @transform_3(%arg0: i32, %arg1: i32) -> (i32, i32, i32) {
    %c0_i32 = arith.constant 0 : i32
    %c0_i32_0 = arith.constant 0 : i32
    return %arg0, %c0_i32, %arg1 : i32, i32, i32
  }
}

</mosaic_0001>

<bundles_post_ra>
// kernel: conv1x1_bn_relu6.2
= control target key start
LH: loop header
LB: loop body
LE: loop exit
PB: predicated region body
PF: predicated region fallthrough
CT: control target
= control target key end

     0   :  { %s469_s9 = smov 0   ;;  %s471_s10 = smov 0   ;;  %s505_s0 = inlined_call_operand.vmem [shape: f32[2,4,256], index: 0, kind: input, shape index: {}]   ;;  %s506_s1 = inlined_call_operand.vmem [shape: f32[2,4,1], index: 1, kind: output, shape index: {0}]   ;;  %s507_s2 = inlined_call_operand.vmem [shape: f32[2,4,4], index: 2, kind: output, shape index: {1}]  }
   0x1   :  { %s473_s11 = smov 0  }
   0x2 LB: > { %s32_s12 = sadd.s32 1, %s447_s10  ;;  %p396_p0 = scmp.ge.s32.totalorder %s451_s11, 1  ;;  %s451_s11 = sphi %s473_s11, %s13_s11   ;;  %s447_s10 = sphi %s471_s10, %s509_s10   ;;  %s443_s9 = sphi %s469_s9, %s508_s9  }
   0x3   : > { %p34_p1 = scmp.ge.s32.totalorder %s32_s12, 2  ;;  %p149_p2 = scmp.lt.s32.totalorder %s451_s11, 3 }
   0x5   : > { %s511_s12 = smov (%p34_p1, %s32_s12), 0  ;;  %p150_p3 = pnand %p396_p0, %p149_p2 }
   0x6   : > { %p183_p4 = scmp.lt.s32.totalorder (!%p150_p3), %s443_s9, 1 }
   0x7   : > { %153 = sbr.rel (%p150_p3) target bundleno = 174 (0xae), region = 24 }
   0xc   : > { %s513_s9 = smov (!%p183_p4, %s443_s9), 1  ;;  %vm221_vm0 = vcmask 1043456   ;;  %vm211_vm1 = vcmask 27648   ;;  %vm209_vm2 = vcmask 3072   ;;  %v453_v10 = vmov 0.0  }
   0xd   : > { %s403_s13 = sshll.u32 %s513_s9, 3  ;;  %s399_s17 = sshll.u32 %s513_s9, 2 }
   0xe   : > { %s190_s16 = scalar_lea.vmem %s505_s0, %s403_s13  ;;  %s203_s20 = scalar_lea.vmem %s507_s2, %s399_s17 }
   0xf   : > { %v213_v0 = vld [vmem:[%s190_s16] sm:$0xff]  ;;  %s197_s23 = scalar_lea.vmem %s506_s1, %s399_s17  ;;  %212 = vst.msk [vmem:[%s203_s20] sm:$0xf] %vm211_vm1, %v453_v10 }
  0x10   : > { %216 = vst [vmem:[#allocation1] ss:$2 sm:$0xff] %v213_v0 }
  0x11   : > { %210 = vst.msk [vmem:[%s197_s23] sm:$0xf] %vm209_vm2, %v453_v10 }
  0x16   : > { %v230_v15 = vld [vmem:[%s203_s20] sm:$0xf] }
  0x17   : > { %v217_v1 = vld.sshfl [vmem:[#allocation1] sm:$0xff pattern:$0x75316420]  ;;  %v218_v2 = vld.sshfl [vmem:[#allocation1 + $0x8] sm:$0xff pattern:$0x75316420] }
  0x18   : > { %231 = vst [vmem:[#allocation1] ss:$2 sm:$0xff] %v213_v0  ;;  %v222_v3 = vsel %vm221_vm0, %v217_v1, 0.0  ;;  %v223_v4 = vsel %vm221_vm0, %v218_v2, 0.0  ;;  %v214_v11 = vld [vmem:[%s197_s23] sm:$0xf] }
  0x19   : > { %v224_v5 = vadd.f32 %v223_v4, %v222_v3 }
  0x1b   : > { %225 = vadd.xlane.f32.xlu0 %v224_v5 }
  0x1f   : > { %v232_v6 = vld.sshfl [vmem:[#allocation1] sm:$0xff pattern:$0x75316420]  ;;  %v233_v7 = vld.sshfl [vmem:[#allocation1 + $0x8] sm:$0xff pattern:$0x75316420] }
  0x20   : > { %236 = vst [vmem:[#allocation1] ss:$2 sm:$0xff] %v213_v0 }
  0x27   : > { %v237_v8 = vld.sshfl [vmem:[#allocation1] sm:$0xff pattern:$0x75316420]  ;;  %v238_v9 = vld.sshfl [vmem:[#allocation1 + $0x8] sm:$0xff pattern:$0x75316420] }
  0x28   : > { %256 = vmatpush.xpose.msra.mxu0 %v237_v8  ;;  %276 = vmatpush.xpose.msra.mxu1 %v238_v9 }
  0x2b   : > { %257 = vmatmul.f32.vlgmr.msra.gmra.mxu0 %v232_v6  ;;  %277 = vmatmul.f32.vlgmr.msra.gmra.mxu1 %v233_v7 }
  0x8e   : > { %v226_v12 = vpop.xlane.xlu0 %225 }
  0x8f   : > { %v227_v13 = vadd.f32 %v226_v12, %v214_v11 }
  0x91   : > { %229 = vst.msk [vmem:[%s197_s23] sm:$0xf] %vm209_vm2, %v227_v13 }
  0xa8   : > { %v258_v14 = vpop.f32.mrf.mxu0  ;;  %v278_v16 = vpop.f32.mrf.mxu1 }
  0xa9   : > { %v279_v17 = vadd.f32 %v278_v16, %v258_v14 }
  0xab   : > { %v281_v18 = vadd.f32 %v279_v17, %v230_v15 }
  0xad   : > { %283 = vst.msk [vmem:[%s203_s20] sm:$0xf] %vm211_vm1, %v281_v18 }
  0xae PF: > { %s13_s11 = sadd.s32 1, %s451_s11   ;;  %s508_s9 = smov %s447_s10 }
  0xaf   : > { %p10_p5 = scmp.ge.s32.totalorder %s13_s11, 4   ;;  %s509_s10 = smov %s511_s12 }
  0xb1   :  { %12 = sbr.rel (!%p10_p5) target bundleno = 2 (0x2), region = 70 }

// kernel: conv1x1_bn_relu6.3
= control target key start
LH: loop header
LB: loop body
LE: loop exit
PB: predicated region body
PF: predicated region fallthrough
CT: control target
= control target key end

     0   :  { %s452_s12 = smov 0   ;;  %s454_s13 = smov 0   ;;  %s491_s0 = inlined_call_operand.vmem [shape: f32[2,4,256], index: 0, kind: input, shape index: {}]   ;;  %s492_s1 = inlined_call_operand.vmem [shape: f32[8,4], index: 1, kind: input, shape index: {}]   ;;  %s493_s2 = inlined_call_operand.vmem [shape: f32[8,1], index: 2, kind: input, shape index: {}]   ;;  %s494_s3 = inlined_call_operand.vmem [shape: f32[2,8,256], index: 3, kind: output, shape index: {}]  }
   0x1   :  { %s456_s14 = smov 0  }
   0x2 LB: > { %s25_s15 = sadd.s32 1, %s425_s13  ;;  %p368_p0 = scmp.ge.s32.totalorder %s429_s14, 1  ;;  %s429_s14 = sphi %s456_s14, %s13_s14   ;;  %s425_s13 = sphi %s454_s13, %s496_s13   ;;  %s421_s12 = sphi %s452_s12, %s495_s12  }
   0x3   : > { %p27_p1 = scmp.ge.s32.totalorder %s25_s15, 2  ;;  %p158_p2 = scmp.lt.s32.totalorder %s429_s14, 3 }
   0x5   : > { %s498_s15 = smov (%p27_p1, %s25_s15), 0  ;;  %p159_p3 = pnand %p368_p0, %p158_p2 }
   0x6   : > { %p191_p4 = scmp.lt.s32.totalorder (!%p159_p3), %s421_s12, 1 }
   0x7   : > { %162 = sbr.rel (%p159_p3) target bundleno = 159 (0x9f), region = 32 }
   0xc   : > { %v212_v0 = vld [vmem:[%s493_s2] sm:$0xff]  ;;  %v431_v1 = vmov 0   ;;  %s500_s12 = smov (!%p191_p4, %s421_s12), 1  ;;  %vm226_vm0 = vcmask 1043456   ;;  %vm222_vm1 = vcmask 31744  }
   0xd   : > { %406 = vset.pattern.permute.xlu0 %v431_v1  ;;  %s379_s18 = sshll.u32 %s500_s12, 3  ;;  %v210_v3 = vld [vmem:[%s492_s1] sm:$0xff]  ;;  %s380_s24 = sshll.u32 %s500_s12, 4 }
   0xe   : > { %215 = vperm.xlu0 %406, %v212_v0   ;;  %s198_s21 = scalar_lea.vmem %s491_s0, %s379_s18  ;;  %s208_s27 = scalar_lea.vmem %s494_s3, %s380_s24 }
   0xf   : > { %v211_v2 = vld [vmem:[%s198_s21] sm:$0xff] }
  0x10   : > { %219 = vst [vmem:[#allocation1] ss:$2 sm:$0xff] %v211_v2 }
  0x17   : > { %v220_v4 = vld.sshfl [vmem:[#allocation1] sm:$0xff pattern:$0x75316420]  ;;  %v221_v5 = vld.sshfl [vmem:[#allocation1 + $0x8] sm:$0xff pattern:$0x75316420] }
  0x18   : > { %373 = vmatpush.msk.msra.mxu0 %vm226_vm0, %v220_v4  ;;  %375 = vmatpush.msk.msra.mxu1 %vm226_vm0, %v221_v5 }
  0x19   : > { %374 = vmatmul.msk.f32.vlgmr.msra.gmra.mxu0 %vm222_vm1, %v210_v3  ;;  %376 = vmatmul.msk.f32.vlgmr.msra.gmra.mxu1 %vm222_vm1, %v210_v3 }
  0x80   : > { %v216_v6 = vpop.permute.xlu0 %215 }
  0x96   : > { %v248_v7 = vpop.f32.mrf.mxu0  ;;  %v268_v8 = vpop.f32.mrf.mxu1 }
  0x97   : > { %v249_v9 = vadd.f32 %v248_v7, %v216_v6  ;;  %v269_v10 = vadd.f32 %v268_v8, %v216_v6 }
  0x99   : > { %v271_v11 = vmax.f32 %v249_v9, 0.0  ;;  %v272_v12 = vmax.f32 %v269_v10, 0.0 }
  0x9b   : > { %v273_v13 = vmin.f32 %v271_v11, 6.0  ;;  %v274_v14 = vmin.f32 %v272_v12, 6.0 }
  0x9d   : > { %275 = vst [vmem:[%s208_s27] sm:$0xff] %v273_v13 }
  0x9e   : > { %276 = vst [vmem:[%s208_s27 + $0x8] sm:$0xff] %v274_v14 }
  0x9f PF: > { %s13_s14 = sadd.s32 1, %s429_s14   ;;  %s495_s12 = smov %s425_s13 }
  0xa0   : > { %p10_p5 = scmp.ge.s32.totalorder %s13_s14, 4   ;;  %s496_s13 = smov %s498_s15 }
  0xa2   :  { %12 = sbr.rel (!%p10_p5) target bundleno = 2 (0x2), region = 62 }

</bundles_post_ra>
